<compile_context>
chip_gen: v5e
topology: v5e:2x2
jax: 0.10.0
libtpu: 0.0.40
codegen_flags: <defaults>
</compile_context>

<pallas_src>
import jax
import jax.numpy as jnp
from jax import lax
from jax.experimental import pallas as pl
from jax.experimental.pallas import tpu as pltpu

# --- module hyper-parameters (forward indexes Q[j+9], so fcs[-1] >= 2*size+10) ----
SIZE   = 8                       # len(x) == fcs[0]
HIDDEN = 32
QLEN   = 2 * SIZE + 10           # 26 == fcs[-1]
FCS    = (SIZE, HIDDEN, QLEN)
NGRID  = 2 * SIZE + 1            # 17 energy-grid points
NPTS   = 101                     # integration points per sample
LANES  = 128                     # lane width of every tile

# --- packed-parameter slab layout (rows of a (PROWS, 128) f32 array) --------------
W1_ROW = 0                       # rows 0..7   : W1^T   (SIZE, HIDDEN)  in lanes 0..31
B1_ROW = SIZE                    # row  8      : b1                     in lanes 0..31
W2_ROW = 16                      # rows 16..47 : W2s^T  (HIDDEN, NGRID) in lanes 0..16
B2_ROW = W2_ROW + HIDDEN         # row  48     : b2s                    in lanes 0..16
PROWS  = 56                      # padded to a multiple of 8 sublanes


def fcn_kernel(wc_ref, x_ref, p_ref, out_ref):
    wc = wc_ref[0, 0]                                            # scalar from SMEM
    x_col = x_ref[...]                                           # (SIZE, 1)
    inv_x = 1.0 / x_col                                          # (SIZE, 1) exact

    # ---- static slices of the packed parameter slab (tile-aligned-ish rows) ----
    w1t = p_ref[W1_ROW:W1_ROW + SIZE, :]                         # (8, 128)
    b1  = p_ref[B1_ROW:B1_ROW + 1, :]                            # (1, 128)
    w2t = p_ref[W2_ROW:W2_ROW + HIDDEN, :]                       # (32, 128)
    b2  = p_ref[B2_ROW:B2_ROW + 1, :]                            # (1, 128)

    # ---- layer 1: h = relu(W1 x + b1) as broadcast-mul + sublane reduce (VPU/XLU)
    h = jnp.sum(x_col * w1t, axis=0, keepdims=True) + b1         # (1, 128)
    h = jnp.maximum(h, 0.0)                                      # pad lanes stay 0

    # ---- layer 2 with the moving average folded into the weights ---------------
    # Sigma[j] = mean_k(Q[j+k]) = h . mean_k(W2[j+k,:]) + mean_k(b2[j+k])
    h8 = jnp.broadcast_to(h[:, :HIDDEN], (SIZE, HIDDEN))         # (8, 32)
    sigma = jnp.dot(h8, w2t, preferred_element_type=jnp.float32) + b2   # (8, 128)
    # rows identical; lanes 0..NGRID-1 hold Sigma, pad lanes are exactly 0

    # ---- per-sample energy samples: lane p -> integration point p (pad lanes clamp)
    lane = lax.broadcasted_iota(jnp.int32, (1, LANES), 1)        # (1, 128)
    t = jnp.minimum(lane, NPTS - 1).astype(jnp.float32)
    s = t * (2.0 / (NPTS - 1)) - 1.0                             # in [-1, 1]
    newE = (wc * x_col) * s                                      # (SIZE, 128)

    # ---- linear interpolation of Sigma on the uniform grid: unrolled hat basis -
    # grid coordinate u = (newE + Wc) * (NGRID-1)/(2*Wc) = (x*s + 1) * (NGRID-1)/2
    u = (x_col * s + 1.0) * ((NGRID - 1) / 2.0)
    u = jnp.clip(u, 0.0, float(NGRID - 1))                       # (SIZE, 128)
    new_sigma = jnp.zeros((SIZE, LANES), jnp.float32)
    for j in range(NGRID):
        # Sigma[j] as a per-sample (SIZE,1) column via masked lane-reduce
        sig_j = jnp.sum(jnp.where(lane == j, sigma, 0.0), axis=1, keepdims=True)
        w_hat = jnp.maximum(0.0, 1.0 - jnp.abs(u - float(j)))    # (SIZE, 128)
        new_sigma = new_sigma + sig_j * w_hat

    # ---- Fermi window (exp argument newE/x == wc*s is sample independent) ------
    er = jnp.exp(wc * s)                                         # (1, 128)  EUP
    window = er / ((er + 1.0) ** 2)                              # (1, 128)
    f1 = new_sigma * (window * inv_x)                            # (SIZE, 128)
    f2 = newE * f1

    # ---- trapezoid quadrature along lanes (uniform spacing dx per sample) ------
    wq = jnp.where(lane > NPTS - 1, 0.0,
                   jnp.where((lane == 0) | (lane == NPTS - 1), 0.5, 1.0))    # (1, 128)
    dx = (2.0 * wc / (NPTS - 1)) * x_col                         # (SIZE, 1)
    o1 = jnp.sum(f1 * wq, axis=1, keepdims=True) * dx            # (SIZE, 1)
    o2 = -jnp.sum(f2 * wq, axis=1, keepdims=True) * dx

    # ---- single full-tile (unmasked) store: lane 0 = out[:size], lane 1 = out[size:]
    out_ref[...] = jnp.where(lane == 0, o1, 0.0) + jnp.where(lane == 1, o2, 0.0)


def prepare_params(params):
    """One-time packing of the MLP parameters into a single lane-dense slab.

    Also folds the 10-point moving average (which is linear) into the second
    layer's weights/bias, so the kernel produces the NGRID Sigma values directly.
    Hoisted out of the per-call path.
    """
    w1, b1, w2, b2 = params
    w1 = w1.astype(jnp.float32); b1 = b1.astype(jnp.float32)
    w2 = w2.astype(jnp.float32); b2 = b2.astype(jnp.float32)

    idx = jnp.arange(NGRID)[:, None] + jnp.arange(10)[None, :]   # (NGRID, 10)
    w2s = jnp.mean(w2[idx], axis=1)                              # (NGRID, HIDDEN)
    b2s = jnp.mean(b2[idx], axis=1)                              # (NGRID,)

    p = jnp.zeros((PROWS, LANES), jnp.float32)
    p = p.at[W1_ROW:W1_ROW + SIZE, :HIDDEN].set(w1.T)            # W1^T
    p = p.at[B1_ROW, :HIDDEN].set(b1)                            # b1
    p = p.at[W2_ROW:W2_ROW + HIDDEN, :NGRID].set(w2s.T)          # (W2 averaged)^T
    p = p.at[B2_ROW, :NGRID].set(b2s)                            # b2 averaged
    return p


@jax.jit
def fcn_forward(x, Wc, packed_params):
    """Call the kernel on the pre-packed parameters and reassemble the (2*size,) output."""
    x_col = x.astype(jnp.float32).reshape(SIZE, 1)
    wc_arr = jnp.full((1, 1), Wc, jnp.float32)

    out = pl.pallas_call(
        fcn_kernel,
        out_shape=jax.ShapeDtypeStruct((SIZE, LANES), jnp.float32),
        in_specs=[
            pl.BlockSpec(memory_space=pltpu.MemorySpace.SMEM),   # Wc (scalar)
            pl.BlockSpec(memory_space=pltpu.MemorySpace.VMEM),   # x column (SIZE, 1)
            pl.BlockSpec(memory_space=pltpu.MemorySpace.VMEM),   # packed params (56, 128)
        ],
        out_specs=pl.BlockSpec(memory_space=pltpu.MemorySpace.VMEM),
    )(wc_arr, x_col, packed_params)

    # lane 0 holds out[:size], lane 1 holds out[size:]
    return jnp.concatenate([out[:, 0], out[:, 1]])


def fcn_reference(x, Wc, params):
    """Pure-JAX reference replicating the PyTorch forward."""
    w1, b1, w2, b2 = params
    h = jnp.maximum(x @ w1.T + b1, 0.0)
    q = h @ w2.T + b2                                            # (QLEN,)
    idx = jnp.arange(NGRID)[:, None] + jnp.arange(10)[None, :]
    sigma = jnp.mean(q[idx], axis=1)                             # (NGRID,)
    energy = jnp.linspace(-Wc, Wc, NGRID)
    o1, o2 = [], []
    for i in range(SIZE):
        xi = x[i]
        newE = jnp.linspace(-Wc * xi, Wc * xi, NPTS)
        newS = jnp.interp(newE, energy, sigma)
        ex = jnp.exp(newE / xi)
        fer = ex / (ex + 1.0) ** 2 / xi
        f1 = newS * fer
        f2 = newE * f1
        o1.append(jnp.trapezoid(f1, newE))
        o2.append(-jnp.trapezoid(f2, newE))
    return jnp.concatenate([jnp.stack(o1), jnp.stack(o2)])


if __name__ == "__main__":
    key = jax.random.PRNGKey(0)
    k1, k2, k3, k4, k5 = jax.random.split(key, 5)
    # deterministic synthetic parameters (shapes from __init__: nn.Linear(fcs[i], fcs[i+1]))
    w1 = jax.random.normal(k1, (HIDDEN, SIZE), jnp.float32) / jnp.sqrt(SIZE)
    b1 = jax.random.normal(k2, (HIDDEN,), jnp.float32) * 0.1
    w2 = jax.random.normal(k3, (QLEN, HIDDEN), jnp.float32) / jnp.sqrt(HIDDEN)
    b2 = jax.random.normal(k4, (QLEN,), jnp.float32) * 0.1
    params = (w1, b1, w2, b2)
    packed = prepare_params(params)          # packing/folding hoisted out of the call path

    # x in (0.3, 1.0]: positive (divides by x[i]) and keeps newE inside [-Wc, Wc]
    x = jax.random.uniform(k5, (SIZE,), jnp.float32, minval=0.3, maxval=1.0)
    Wc = 2.0

    out = jax.block_until_ready(fcn_forward(x, Wc, packed))
    ref = fcn_reference(x, Wc, params)

    assert out.shape == (2 * SIZE,)
    assert bool(jnp.all(jnp.isfinite(out)))
    assert bool(jnp.allclose(out, ref, rtol=5e-3, atol=1e-5)), (out, ref)
    # TODO(synk): self.parameter1 / func1 are unused by forward and not translated.
    print("KERNEL_OK")
</pallas_src>

<mosaic_0001>
module attributes {stable_mosaic.version = 11 : i64} {
  func.func @fcn_kernel(%arg0: memref<1x1xf32, #tpu.memory_space<smem>>, %arg1: memref<8x1xf32, #tpu.memory_space<vmem>>, %arg2: memref<56x128xf32, #tpu.memory_space<vmem>>, %arg3: memref<8x128xf32, #tpu.memory_space<vmem>>) attributes {dimension_semantics = [], scalar_prefetch = 0 : i64, scratch_operands = 0 : i64, tpu.core_type = #tpu.core_type<tc>} {
    %c0 = arith.constant 0 : index
    %c0_0 = arith.constant 0 : index
    %0 = memref.load %arg0[%c0, %c0_0] : memref<1x1xf32, #tpu.memory_space<smem>>
    %c0_1 = arith.constant 0 : index
    %c0_2 = arith.constant 0 : index
    %1 = vector.load %arg1[%c0_1, %c0_2] : memref<8x1xf32, #tpu.memory_space<vmem>>, vector<8x1xf32>
    %cst = arith.constant 1.000000e+00 : f32
    %2 = vector.broadcast %cst : f32 to vector<8x1xf32>
    %3 = arith.divf %2, %1 : vector<8x1xf32>
    %c0_3 = arith.constant 0 : index
    %c0_4 = arith.constant 0 : index
    %4 = vector.load %arg2[%c0_3, %c0_4] : memref<56x128xf32, #tpu.memory_space<vmem>>, vector<8x128xf32>
    %c8 = arith.constant 8 : index
    %c0_5 = arith.constant 0 : index
    %5 = vector.load %arg2[%c8, %c0_5] : memref<56x128xf32, #tpu.memory_space<vmem>>, vector<1x128xf32>
    %c16 = arith.constant 16 : index
    %c0_6 = arith.constant 0 : index
    %6 = vector.load %arg2[%c16, %c0_6] : memref<56x128xf32, #tpu.memory_space<vmem>>, vector<32x128xf32>
    %c48 = arith.constant 48 : index
    %c0_7 = arith.constant 0 : index
    %7 = vector.load %arg2[%c48, %c0_7] : memref<56x128xf32, #tpu.memory_space<vmem>>, vector<1x128xf32>
    %8 = vector.broadcast %1 : vector<8x1xf32> to vector<8x128xf32>
    %9 = arith.mulf %8, %4 : vector<8x128xf32>
    %cst_8 = arith.constant dense<0.000000e+00> : vector<128xf32>
    %10 = vector.multi_reduction <add>, %9, %cst_8 [0] : vector<8x128xf32> to vector<128xf32>
    %11 = vector.shape_cast %10 : vector<128xf32> to vector<1x128xf32>
    %12 = arith.addf %11, %5 : vector<1x128xf32>
    %cst_9 = arith.constant 0.000000e+00 : f32
    %13 = vector.broadcast %cst_9 : f32 to vector<1x128xf32>
    %14 = arith.maximumf %12, %13 : vector<1x128xf32>
    %15 = vector.extract_strided_slice %14 {offsets = [0, 0], sizes = [1, 32], strides = [1, 1]} : vector<1x128xf32> to vector<1x32xf32>
    %16 = vector.shape_cast %15 : vector<1x32xf32> to vector<1x32xf32>
    %17 = vector.broadcast %16 : vector<1x32xf32> to vector<8x32xf32>
    %cst_10 = arith.constant dense<0.000000e+00> : vector<8x128xf32>
    %18 = tpu.matmul %17, %6, %cst_10 {dimension_numbers = #tpu.dot_dimension_numbers<[1], [0], [0], [1], [0, 0, 1, 1], [], []>} : vector<8x32xf32>, vector<32x128xf32>, vector<8x128xf32> -> vector<8x128xf32>
    %19 = vector.broadcast %7 : vector<1x128xf32> to vector<8x128xf32>
    %20 = arith.addf %18, %19 : vector<8x128xf32>
    %21 = tpu.iota {dimensions = array<i32: 1>} : vector<1x128xi32>
    %c100_i32 = arith.constant 100 : i32
    %22 = vector.broadcast %c100_i32 : i32 to vector<1x128xi32>
    %23 = arith.minsi %21, %22 : vector<1x128xi32>
    %24 = arith.sitofp %23 : vector<1x128xi32> to vector<1x128xf32>
    %cst_11 = arith.constant 2.000000e-02 : f32
    %25 = vector.broadcast %cst_11 : f32 to vector<1x128xf32>
    %26 = arith.mulf %24, %25 : vector<1x128xf32>
    %cst_12 = arith.constant 1.000000e+00 : f32
    %27 = vector.broadcast %cst_12 : f32 to vector<1x128xf32>
    %28 = arith.subf %26, %27 : vector<1x128xf32>
    %29 = vector.broadcast %0 : f32 to vector<8x1xf32>
    %30 = arith.mulf %29, %1 : vector<8x1xf32>
    %31 = vector.broadcast %30 : vector<8x1xf32> to vector<8x128xf32>
    %32 = vector.broadcast %28 : vector<1x128xf32> to vector<8x128xf32>
    %33 = arith.mulf %31, %32 : vector<8x128xf32>
    %34 = vector.broadcast %1 : vector<8x1xf32> to vector<8x128xf32>
    %35 = vector.broadcast %28 : vector<1x128xf32> to vector<8x128xf32>
    %36 = arith.mulf %34, %35 : vector<8x128xf32>
    %cst_13 = arith.constant 1.000000e+00 : f32
    %37 = vector.broadcast %cst_13 : f32 to vector<8x128xf32>
    %38 = arith.addf %36, %37 : vector<8x128xf32>
    %cst_14 = arith.constant 8.000000e+00 : f32
    %39 = vector.broadcast %cst_14 : f32 to vector<8x128xf32>
    %40 = arith.mulf %38, %39 : vector<8x128xf32>
    %cst_15 = arith.constant 0.000000e+00 : f32
    %cst_16 = arith.constant 1.600000e+01 : f32
    %41 = vector.broadcast %cst_15 : f32 to vector<8x128xf32>
    %42 = arith.maximumf %41, %40 : vector<8x128xf32>
    %43 = vector.broadcast %cst_16 : f32 to vector<8x128xf32>
    %44 = arith.minimumf %43, %42 : vector<8x128xf32>
    %cst_17 = arith.constant 0.000000e+00 : f32
    %45 = vector.broadcast %cst_17 : f32 to vector<8x128xf32>
    %c0_i32 = arith.constant 0 : i32
    %46 = vector.broadcast %c0_i32 : i32 to vector<1x128xi32>
    %47 = arith.cmpi eq, %21, %46 : vector<1x128xi32>
    %cst_18 = arith.constant 0.000000e+00 : f32
    %48 = vector.shape_cast %47 : vector<1x128xi1> to vector<1x128xi1>
    %49 = vector.broadcast %48 : vector<1x128xi1> to vector<8x128xi1>
    %50 = vector.broadcast %cst_18 : f32 to vector<8x128xf32>
    %51 = arith.select %49, %20, %50 : vector<8x128xi1>, vector<8x128xf32>
    %cst_19 = arith.constant dense<0.000000e+00> : vector<8xf32>
    %52 = vector.multi_reduction <add>, %51, %cst_19 [1] : vector<8x128xf32> to vector<8xf32>
    %53 = vector.shape_cast %52 : vector<8xf32> to vector<8x1xf32>
    %cst_20 = arith.constant 0.000000e+00 : f32
    %54 = vector.broadcast %cst_20 : f32 to vector<8x128xf32>
    %55 = arith.subf %44, %54 : vector<8x128xf32>
    %56 = math.absf %55 : vector<8x128xf32>
    %cst_21 = arith.constant 1.000000e+00 : f32
    %57 = vector.broadcast %cst_21 : f32 to vector<8x128xf32>
    %58 = arith.subf %57, %56 : vector<8x128xf32>
    %cst_22 = arith.constant 0.000000e+00 : f32
    %59 = vector.broadcast %cst_22 : f32 to vector<8x128xf32>
    %60 = arith.maximumf %59, %58 : vector<8x128xf32>
    %61 = vector.broadcast %53 : vector<8x1xf32> to vector<8x128xf32>
    %62 = arith.mulf %61, %60 : vector<8x128xf32>
    %63 = arith.addf %45, %62 : vector<8x128xf32>
    %c1_i32 = arith.constant 1 : i32
    %64 = vector.broadcast %c1_i32 : i32 to vector<1x128xi32>
    %65 = arith.cmpi eq, %21, %64 : vector<1x128xi32>
    %cst_23 = arith.constant 0.000000e+00 : f32
    %66 = vector.shape_cast %65 : vector<1x128xi1> to vector<1x128xi1>
    %67 = vector.broadcast %66 : vector<1x128xi1> to vector<8x128xi1>
    %68 = vector.broadcast %cst_23 : f32 to vector<8x128xf32>
    %69 = arith.select %67, %20, %68 : vector<8x128xi1>, vector<8x128xf32>
    %cst_24 = arith.constant dense<0.000000e+00> : vector<8xf32>
    %70 = vector.multi_reduction <add>, %69, %cst_24 [1] : vector<8x128xf32> to vector<8xf32>
    %71 = vector.shape_cast %70 : vector<8xf32> to vector<8x1xf32>
    %cst_25 = arith.constant 1.000000e+00 : f32
    %72 = vector.broadcast %cst_25 : f32 to vector<8x128xf32>
    %73 = arith.subf %44, %72 : vector<8x128xf32>
    %74 = math.absf %73 : vector<8x128xf32>
    %cst_26 = arith.constant 1.000000e+00 : f32
    %75 = vector.broadcast %cst_26 : f32 to vector<8x128xf32>
    %76 = arith.subf %75, %74 : vector<8x128xf32>
    %cst_27 = arith.constant 0.000000e+00 : f32
    %77 = vector.broadcast %cst_27 : f32 to vector<8x128xf32>
    %78 = arith.maximumf %77, %76 : vector<8x128xf32>
    %79 = vector.broadcast %71 : vector<8x1xf32> to vector<8x128xf32>
    %80 = arith.mulf %79, %78 : vector<8x128xf32>
    %81 = arith.addf %63, %80 : vector<8x128xf32>
    %c2_i32 = arith.constant 2 : i32
    %82 = vector.broadcast %c2_i32 : i32 to vector<1x128xi32>
    %83 = arith.cmpi eq, %21, %82 : vector<1x128xi32>
    %cst_28 = arith.constant 0.000000e+00 : f32
    %84 = vector.shape_cast %83 : vector<1x128xi1> to vector<1x128xi1>
    %85 = vector.broadcast %84 : vector<1x128xi1> to vector<8x128xi1>
    %86 = vector.broadcast %cst_28 : f32 to vector<8x128xf32>
    %87 = arith.select %85, %20, %86 : vector<8x128xi1>, vector<8x128xf32>
    %cst_29 = arith.constant dense<0.000000e+00> : vector<8xf32>
    %88 = vector.multi_reduction <add>, %87, %cst_29 [1] : vector<8x128xf32> to vector<8xf32>
    %89 = vector.shape_cast %88 : vector<8xf32> to vector<8x1xf32>
    %cst_30 = arith.constant 2.000000e+00 : f32
    %90 = vector.broadcast %cst_30 : f32 to vector<8x128xf32>
    %91 = arith.subf %44, %90 : vector<8x128xf32>
    %92 = math.absf %91 : vector<8x128xf32>
    %cst_31 = arith.constant 1.000000e+00 : f32
    %93 = vector.broadcast %cst_31 : f32 to vector<8x128xf32>
    %94 = arith.subf %93, %92 : vector<8x128xf32>
    %cst_32 = arith.constant 0.000000e+00 : f32
    %95 = vector.broadcast %cst_32 : f32 to vector<8x128xf32>
    %96 = arith.maximumf %95, %94 : vector<8x128xf32>
    %97 = vector.broadcast %89 : vector<8x1xf32> to vector<8x128xf32>
    %98 = arith.mulf %97, %96 : vector<8x128xf32>
    %99 = arith.addf %81, %98 : vector<8x128xf32>
    %c3_i32 = arith.constant 3 : i32
    %100 = vector.broadcast %c3_i32 : i32 to vector<1x128xi32>
    %101 = arith.cmpi eq, %21, %100 : vector<1x128xi32>
    %cst_33 = arith.constant 0.000000e+00 : f32
    %102 = vector.shape_cast %101 : vector<1x128xi1> to vector<1x128xi1>
    %103 = vector.broadcast %102 : vector<1x128xi1> to vector<8x128xi1>
    %104 = vector.broadcast %cst_33 : f32 to vector<8x128xf32>
    %105 = arith.select %103, %20, %104 : vector<8x128xi1>, vector<8x128xf32>
    %cst_34 = arith.constant dense<0.000000e+00> : vector<8xf32>
    %106 = vector.multi_reduction <add>, %105, %cst_34 [1] : vector<8x128xf32> to vector<8xf32>
    %107 = vector.shape_cast %106 : vector<8xf32> to vector<8x1xf32>
    %cst_35 = arith.constant 3.000000e+00 : f32
    %108 = vector.broadcast %cst_35 : f32 to vector<8x128xf32>
    %109 = arith.subf %44, %108 : vector<8x128xf32>
    %110 = math.absf %109 : vector<8x128xf32>
    %cst_36 = arith.constant 1.000000e+00 : f32
    %111 = vector.broadcast %cst_36 : f32 to vector<8x128xf32>
    %112 = arith.subf %111, %110 : vector<8x128xf32>
    %cst_37 = arith.constant 0.000000e+00 : f32
    %113 = vector.broadcast %cst_37 : f32 to vector<8x128xf32>
    %114 = arith.maximumf %113, %112 : vector<8x128xf32>
    %115 = vector.broadcast %107 : vector<8x1xf32> to vector<8x128xf32>
    %116 = arith.mulf %115, %114 : vector<8x128xf32>
    %117 = arith.addf %99, %116 : vector<8x128xf32>
    %c4_i32 = arith.constant 4 : i32
    %118 = vector.broadcast %c4_i32 : i32 to vector<1x128xi32>
    %119 = arith.cmpi eq, %21, %118 : vector<1x128xi32>
    %cst_38 = arith.constant 0.000000e+00 : f32
    %120 = vector.shape_cast %119 : vector<1x128xi1> to vector<1x128xi1>
    %121 = vector.broadcast %120 : vector<1x128xi1> to vector<8x128xi1>
    %122 = vector.broadcast %cst_38 : f32 to vector<8x128xf32>
    %123 = arith.select %121, %20, %122 : vector<8x128xi1>, vector<8x128xf32>
    %cst_39 = arith.constant dense<0.000000e+00> : vector<8xf32>
    %124 = vector.multi_reduction <add>, %123, %cst_39 [1] : vector<8x128xf32> to vector<8xf32>
    %125 = vector.shape_cast %124 : vector<8xf32> to vector<8x1xf32>
    %cst_40 = arith.constant 4.000000e+00 : f32
    %126 = vector.broadcast %cst_40 : f32 to vector<8x128xf32>
    %127 = arith.subf %44, %126 : vector<8x128xf32>
    %128 = math.absf %127 : vector<8x128xf32>
    %cst_41 = arith.constant 1.000000e+00 : f32
    %129 = vector.broadcast %cst_41 : f32 to vector<8x128xf32>
    %130 = arith.subf %129, %128 : vector<8x128xf32>
    %cst_42 = arith.constant 0.000000e+00 : f32
    %131 = vector.broadcast %cst_42 : f32 to vector<8x128xf32>
    %132 = arith.maximumf %131, %130 : vector<8x128xf32>
    %133 = vector.broadcast %125 : vector<8x1xf32> to vector<8x128xf32>
    %134 = arith.mulf %133, %132 : vector<8x128xf32>
    %135 = arith.addf %117, %134 : vector<8x128xf32>
    %c5_i32 = arith.constant 5 : i32
    %136 = vector.broadcast %c5_i32 : i32 to vector<1x128xi32>
    %137 = arith.cmpi eq, %21, %136 : vector<1x128xi32>
    %cst_43 = arith.constant 0.000000e+00 : f32
    %138 = vector.shape_cast %137 : vector<1x128xi1> to vector<1x128xi1>
    %139 = vector.broadcast %138 : vector<1x128xi1> to vector<8x128xi1>
    %140 = vector.broadcast %cst_43 : f32 to vector<8x128xf32>
    %141 = arith.select %139, %20, %140 : vector<8x128xi1>, vector<8x128xf32>
    %cst_44 = arith.constant dense<0.000000e+00> : vector<8xf32>
    %142 = vector.multi_reduction <add>, %141, %cst_44 [1] : vector<8x128xf32> to vector<8xf32>
    %143 = vector.shape_cast %142 : vector<8xf32> to vector<8x1xf32>
    %cst_45 = arith.constant 5.000000e+00 : f32
    %144 = vector.broadcast %cst_45 : f32 to vector<8x128xf32>
    %145 = arith.subf %44, %144 : vector<8x128xf32>
    %146 = math.absf %145 : vector<8x128xf32>
    %cst_46 = arith.constant 1.000000e+00 : f32
    %147 = vector.broadcast %cst_46 : f32 to vector<8x128xf32>
    %148 = arith.subf %147, %146 : vector<8x128xf32>
    %cst_47 = arith.constant 0.000000e+00 : f32
    %149 = vector.broadcast %cst_47 : f32 to vector<8x128xf32>
    %150 = arith.maximumf %149, %148 : vector<8x128xf32>
    %151 = vector.broadcast %143 : vector<8x1xf32> to vector<8x128xf32>
    %152 = arith.mulf %151, %150 : vector<8x128xf32>
    %153 = arith.addf %135, %152 : vector<8x128xf32>
    %c6_i32 = arith.constant 6 : i32
    %154 = vector.broadcast %c6_i32 : i32 to vector<1x128xi32>
    %155 = arith.cmpi eq, %21, %154 : vector<1x128xi32>
    %cst_48 = arith.constant 0.000000e+00 : f32
    %156 = vector.shape_cast %155 : vector<1x128xi1> to vector<1x128xi1>
    %157 = vector.broadcast %156 : vector<1x128xi1> to vector<8x128xi1>
    %158 = vector.broadcast %cst_48 : f32 to vector<8x128xf32>
    %159 = arith.select %157, %20, %158 : vector<8x128xi1>, vector<8x128xf32>
    %cst_49 = arith.constant dense<0.000000e+00> : vector<8xf32>
    %160 = vector.multi_reduction <add>, %159, %cst_49 [1] : vector<8x128xf32> to vector<8xf32>
    %161 = vector.shape_cast %160 : vector<8xf32> to vector<8x1xf32>
    %cst_50 = arith.constant 6.000000e+00 : f32
    %162 = vector.broadcast %cst_50 : f32 to vector<8x128xf32>
    %163 = arith.subf %44, %162 : vector<8x128xf32>
    %164 = math.absf %163 : vector<8x128xf32>
    %cst_51 = arith.constant 1.000000e+00 : f32
    %165 = vector.broadcast %cst_51 : f32 to vector<8x128xf32>
    %166 = arith.subf %165, %164 : vector<8x128xf32>
    %cst_52 = arith.constant 0.000000e+00 : f32
    %167 = vector.broadcast %cst_52 : f32 to vector<8x128xf32>
    %168 = arith.maximumf %167, %166 : vector<8x128xf32>
    %169 = vector.broadcast %161 : vector<8x1xf32> to vector<8x128xf32>
    %170 = arith.mulf %169, %168 : vector<8x128xf32>
    %171 = arith.addf %153, %170 : vector<8x128xf32>
    %c7_i32 = arith.constant 7 : i32
    %172 = vector.broadcast %c7_i32 : i32 to vector<1x128xi32>
    %173 = arith.cmpi eq, %21, %172 : vector<1x128xi32>
    %cst_53 = arith.constant 0.000000e+00 : f32
    %174 = vector.shape_cast %173 : vector<1x128xi1> to vector<1x128xi1>
    %175 = vector.broadcast %174 : vector<1x128xi1> to vector<8x128xi1>
    %176 = vector.broadcast %cst_53 : f32 to vector<8x128xf32>
    %177 = arith.select %175, %20, %176 : vector<8x128xi1>, vector<8x128xf32>
    %cst_54 = arith.constant dense<0.000000e+00> : vector<8xf32>
    %178 = vector.multi_reduction <add>, %177, %cst_54 [1] : vector<8x128xf32> to vector<8xf32>
    %179 = vector.shape_cast %178 : vector<8xf32> to vector<8x1xf32>
    %cst_55 = arith.constant 7.000000e+00 : f32
    %180 = vector.broadcast %cst_55 : f32 to vector<8x128xf32>
    %181 = arith.subf %44, %180 : vector<8x128xf32>
    %182 = math.absf %181 : vector<8x128xf32>
    %cst_56 = arith.constant 1.000000e+00 : f32
    %183 = vector.broadcast %cst_56 : f32 to vector<8x128xf32>
    %184 = arith.subf %183, %182 : vector<8x128xf32>
    %cst_57 = arith.constant 0.000000e+00 : f32
    %185 = vector.broadcast %cst_57 : f32 to vector<8x128xf32>
    %186 = arith.maximumf %185, %184 : vector<8x128xf32>
    %187 = vector.broadcast %179 : vector<8x1xf32> to vector<8x128xf32>
    %188 = arith.mulf %187, %186 : vector<8x128xf32>
    %189 = arith.addf %171, %188 : vector<8x128xf32>
    %c8_i32 = arith.constant 8 : i32
    %190 = vector.broadcast %c8_i32 : i32 to vector<1x128xi32>
    %191 = arith.cmpi eq, %21, %190 : vector<1x128xi32>
    %cst_58 = arith.constant 0.000000e+00 : f32
    %192 = vector.shape_cast %191 : vector<1x128xi1> to vector<1x128xi1>
    %193 = vector.broadcast %192 : vector<1x128xi1> to vector<8x128xi1>
    %194 = vector.broadcast %cst_58 : f32 to vector<8x128xf32>
    %195 = arith.select %193, %20, %194 : vector<8x128xi1>, vector<8x128xf32>
    %cst_59 = arith.constant dense<0.000000e+00> : vector<8xf32>
    %196 = vector.multi_reduction <add>, %195, %cst_59 [1] : vector<8x128xf32> to vector<8xf32>
    %197 = vector.shape_cast %196 : vector<8xf32> to vector<8x1xf32>
    %cst_60 = arith.constant 8.000000e+00 : f32
    %198 = vector.broadcast %cst_60 : f32 to vector<8x128xf32>
    %199 = arith.subf %44, %198 : vector<8x128xf32>
    %200 = math.absf %199 : vector<8x128xf32>
    %cst_61 = arith.constant 1.000000e+00 : f32
    %201 = vector.broadcast %cst_61 : f32 to vector<8x128xf32>
    %202 = arith.subf %201, %200 : vector<8x128xf32>
    %cst_62 = arith.constant 0.000000e+00 : f32
    %203 = vector.broadcast %cst_62 : f32 to vector<8x128xf32>
    %204 = arith.maximumf %203, %202 : vector<8x128xf32>
    %205 = vector.broadcast %197 : vector<8x1xf32> to vector<8x128xf32>
    %206 = arith.mulf %205, %204 : vector<8x128xf32>
    %207 = arith.addf %189, %206 : vector<8x128xf32>
    %c9_i32 = arith.constant 9 : i32
    %208 = vector.broadcast %c9_i32 : i32 to vector<1x128xi32>
    %209 = arith.cmpi eq, %21, %208 : vector<1x128xi32>
    %cst_63 = arith.constant 0.000000e+00 : f32
    %210 = vector.shape_cast %209 : vector<1x128xi1> to vector<1x128xi1>
    %211 = vector.broadcast %210 : vector<1x128xi1> to vector<8x128xi1>
    %212 = vector.broadcast %cst_63 : f32 to vector<8x128xf32>
    %213 = arith.select %211, %20, %212 : vector<8x128xi1>, vector<8x128xf32>
    %cst_64 = arith.constant dense<0.000000e+00> : vector<8xf32>
    %214 = vector.multi_reduction <add>, %213, %cst_64 [1] : vector<8x128xf32> to vector<8xf32>
    %215 = vector.shape_cast %214 : vector<8xf32> to vector<8x1xf32>
    %cst_65 = arith.constant 9.000000e+00 : f32
    %216 = vector.broadcast %cst_65 : f32 to vector<8x128xf32>
    %217 = arith.subf %44, %216 : vector<8x128xf32>
    %218 = math.absf %217 : vector<8x128xf32>
    %cst_66 = arith.constant 1.000000e+00 : f32
    %219 = vector.broadcast %cst_66 : f32 to vector<8x128xf32>
    %220 = arith.subf %219, %218 : vector<8x128xf32>
    %cst_67 = arith.constant 0.000000e+00 : f32
    %221 = vector.broadcast %cst_67 : f32 to vector<8x128xf32>
    %222 = arith.maximumf %221, %220 : vector<8x128xf32>
    %223 = vector.broadcast %215 : vector<8x1xf32> to vector<8x128xf32>
    %224 = arith.mulf %223, %222 : vector<8x128xf32>
    %225 = arith.addf %207, %224 : vector<8x128xf32>
    %c10_i32 = arith.constant 10 : i32
    %226 = vector.broadcast %c10_i32 : i32 to vector<1x128xi32>
    %227 = arith.cmpi eq, %21, %226 : vector<1x128xi32>
    %cst_68 = arith.constant 0.000000e+00 : f32
    %228 = vector.shape_cast %227 : vector<1x128xi1> to vector<1x128xi1>
    %229 = vector.broadcast %228 : vector<1x128xi1> to vector<8x128xi1>
    %230 = vector.broadcast %cst_68 : f32 to vector<8x128xf32>
    %231 = arith.select %229, %20, %230 : vector<8x128xi1>, vector<8x128xf32>
    %cst_69 = arith.constant dense<0.000000e+00> : vector<8xf32>
    %232 = vector.multi_reduction <add>, %231, %cst_69 [1] : vector<8x128xf32> to vector<8xf32>
    %233 = vector.shape_cast %232 : vector<8xf32> to vector<8x1xf32>
    %cst_70 = arith.constant 1.000000e+01 : f32
    %234 = vector.broadcast %cst_70 : f32 to vector<8x128xf32>
    %235 = arith.subf %44, %234 : vector<8x128xf32>
    %236 = math.absf %235 : vector<8x128xf32>
    %cst_71 = arith.constant 1.000000e+00 : f32
    %237 = vector.broadcast %cst_71 : f32 to vector<8x128xf32>
    %238 = arith.subf %237, %236 : vector<8x128xf32>
    %cst_72 = arith.constant 0.000000e+00 : f32
    %239 = vector.broadcast %cst_72 : f32 to vector<8x128xf32>
    %240 = arith.maximumf %239, %238 : vector<8x128xf32>
    %241 = vector.broadcast %233 : vector<8x1xf32> to vector<8x128xf32>
    %242 = arith.mulf %241, %240 : vector<8x128xf32>
    %243 = arith.addf %225, %242 : vector<8x128xf32>
    %c11_i32 = arith.constant 11 : i32
    %244 = vector.broadcast %c11_i32 : i32 to vector<1x128xi32>
    %245 = arith.cmpi eq, %21, %244 : vector<1x128xi32>
    %cst_73 = arith.constant 0.000000e+00 : f32
    %246 = vector.shape_cast %245 : vector<1x128xi1> to vector<1x128xi1>
    %247 = vector.broadcast %246 : vector<1x128xi1> to vector<8x128xi1>
    %248 = vector.broadcast %cst_73 : f32 to vector<8x128xf32>
    %249 = arith.select %247, %20, %248 : vector<8x128xi1>, vector<8x128xf32>
    %cst_74 = arith.constant dense<0.000000e+00> : vector<8xf32>
    %250 = vector.multi_reduction <add>, %249, %cst_74 [1] : vector<8x128xf32> to vector<8xf32>
    %251 = vector.shape_cast %250 : vector<8xf32> to vector<8x1xf32>
    %cst_75 = arith.constant 1.100000e+01 : f32
    %252 = vector.broadcast %cst_75 : f32 to vector<8x128xf32>
    %253 = arith.subf %44, %252 : vector<8x128xf32>
    %254 = math.absf %253 : vector<8x128xf32>
    %cst_76 = arith.constant 1.000000e+00 : f32
    %255 = vector.broadcast %cst_76 : f32 to vector<8x128xf32>
    %256 = arith.subf %255, %254 : vector<8x128xf32>
    %cst_77 = arith.constant 0.000000e+00 : f32
    %257 = vector.broadcast %cst_77 : f32 to vector<8x128xf32>
    %258 = arith.maximumf %257, %256 : vector<8x128xf32>
    %259 = vector.broadcast %251 : vector<8x1xf32> to vector<8x128xf32>
    %260 = arith.mulf %259, %258 : vector<8x128xf32>
    %261 = arith.addf %243, %260 : vector<8x128xf32>
    %c12_i32 = arith.constant 12 : i32
    %262 = vector.broadcast %c12_i32 : i32 to vector<1x128xi32>
    %263 = arith.cmpi eq, %21, %262 : vector<1x128xi32>
    %cst_78 = arith.constant 0.000000e+00 : f32
    %264 = vector.shape_cast %263 : vector<1x128xi1> to vector<1x128xi1>
    %265 = vector.broadcast %264 : vector<1x128xi1> to vector<8x128xi1>
    %266 = vector.broadcast %cst_78 : f32 to vector<8x128xf32>
    %267 = arith.select %265, %20, %266 : vector<8x128xi1>, vector<8x128xf32>
    %cst_79 = arith.constant dense<0.000000e+00> : vector<8xf32>
    %268 = vector.multi_reduction <add>, %267, %cst_79 [1] : vector<8x128xf32> to vector<8xf32>
    %269 = vector.shape_cast %268 : vector<8xf32> to vector<8x1xf32>
    %cst_80 = arith.constant 1.200000e+01 : f32
    %270 = vector.broadcast %cst_80 : f32 to vector<8x128xf32>
    %271 = arith.subf %44, %270 : vector<8x128xf32>
    %272 = math.absf %271 : vector<8x128xf32>
    %cst_81 = arith.constant 1.000000e+00 : f32
    %273 = vector.broadcast %cst_81 : f32 to vector<8x128xf32>
    %274 = arith.subf %273, %272 : vector<8x128xf32>
    %cst_82 = arith.constant 0.000000e+00 : f32
    %275 = vector.broadcast %cst_82 : f32 to vector<8x128xf32>
    %276 = arith.maximumf %275, %274 : vector<8x128xf32>
    %277 = vector.broadcast %269 : vector<8x1xf32> to vector<8x128xf32>
    %278 = arith.mulf %277, %276 : vector<8x128xf32>
    %279 = arith.addf %261, %278 : vector<8x128xf32>
    %c13_i32 = arith.constant 13 : i32
    %280 = vector.broadcast %c13_i32 : i32 to vector<1x128xi32>
    %281 = arith.cmpi eq, %21, %280 : vector<1x128xi32>
    %cst_83 = arith.constant 0.000000e+00 : f32
    %282 = vector.shape_cast %281 : vector<1x128xi1> to vector<1x128xi1>
    %283 = vector.broadcast %282 : vector<1x128xi1> to vector<8x128xi1>
    %284 = vector.broadcast %cst_83 : f32 to vector<8x128xf32>
    %285 = arith.select %283, %20, %284 : vector<8x128xi1>, vector<8x128xf32>
    %cst_84 = arith.constant dense<0.000000e+00> : vector<8xf32>
    %286 = vector.multi_reduction <add>, %285, %cst_84 [1] : vector<8x128xf32> to vector<8xf32>
    %287 = vector.shape_cast %286 : vector<8xf32> to vector<8x1xf32>
    %cst_85 = arith.constant 1.300000e+01 : f32
    %288 = vector.broadcast %cst_85 : f32 to vector<8x128xf32>
    %289 = arith.subf %44, %288 : vector<8x128xf32>
    %290 = math.absf %289 : vector<8x128xf32>
    %cst_86 = arith.constant 1.000000e+00 : f32
    %291 = vector.broadcast %cst_86 : f32 to vector<8x128xf32>
    %292 = arith.subf %291, %290 : vector<8x128xf32>
    %cst_87 = arith.constant 0.000000e+00 : f32
    %293 = vector.broadcast %cst_87 : f32 to vector<8x128xf32>
    %294 = arith.maximumf %293, %292 : vector<8x128xf32>
    %295 = vector.broadcast %287 : vector<8x1xf32> to vector<8x128xf32>
    %296 = arith.mulf %295, %294 : vector<8x128xf32>
    %297 = arith.addf %279, %296 : vector<8x128xf32>
    %c14_i32 = arith.constant 14 : i32
    %298 = vector.broadcast %c14_i32 : i32 to vector<1x128xi32>
    %299 = arith.cmpi eq, %21, %298 : vector<1x128xi32>
    %cst_88 = arith.constant 0.000000e+00 : f32
    %300 = vector.shape_cast %299 : vector<1x128xi1> to vector<1x128xi1>
    %301 = vector.broadcast %300 : vector<1x128xi1> to vector<8x128xi1>
    %302 = vector.broadcast %cst_88 : f32 to vector<8x128xf32>
    %303 = arith.select %301, %20, %302 : vector<8x128xi1>, vector<8x128xf32>
    %cst_89 = arith.constant dense<0.000000e+00> : vector<8xf32>
    %304 = vector.multi_reduction <add>, %303, %cst_89 [1] : vector<8x128xf32> to vector<8xf32>
    %305 = vector.shape_cast %304 : vector<8xf32> to vector<8x1xf32>
    %cst_90 = arith.constant 1.400000e+01 : f32
    %306 = vector.broadcast %cst_90 : f32 to vector<8x128xf32>
    %307 = arith.subf %44, %306 : vector<8x128xf32>
    %308 = math.absf %307 : vector<8x128xf32>
    %cst_91 = arith.constant 1.000000e+00 : f32
    %309 = vector.broadcast %cst_91 : f32 to vector<8x128xf32>
    %310 = arith.subf %309, %308 : vector<8x128xf32>
    %cst_92 = arith.constant 0.000000e+00 : f32
    %311 = vector.broadcast %cst_92 : f32 to vector<8x128xf32>
    %312 = arith.maximumf %311, %310 : vector<8x128xf32>
    %313 = vector.broadcast %305 : vector<8x1xf32> to vector<8x128xf32>
    %314 = arith.mulf %313, %312 : vector<8x128xf32>
    %315 = arith.addf %297, %314 : vector<8x128xf32>
    %c15_i32 = arith.constant 15 : i32
    %316 = vector.broadcast %c15_i32 : i32 to vector<1x128xi32>
    %317 = arith.cmpi eq, %21, %316 : vector<1x128xi32>
    %cst_93 = arith.constant 0.000000e+00 : f32
    %318 = vector.shape_cast %317 : vector<1x128xi1> to vector<1x128xi1>
    %319 = vector.broadcast %318 : vector<1x128xi1> to vector<8x128xi1>
    %320 = vector.broadcast %cst_93 : f32 to vector<8x128xf32>
    %321 = arith.select %319, %20, %320 : vector<8x128xi1>, vector<8x128xf32>
    %cst_94 = arith.constant dense<0.000000e+00> : vector<8xf32>
    %322 = vector.multi_reduction <add>, %321, %cst_94 [1] : vector<8x128xf32> to vector<8xf32>
    %323 = vector.shape_cast %322 : vector<8xf32> to vector<8x1xf32>
    %cst_95 = arith.constant 1.500000e+01 : f32
    %324 = vector.broadcast %cst_95 : f32 to vector<8x128xf32>
    %325 = arith.subf %44, %324 : vector<8x128xf32>
    %326 = math.absf %325 : vector<8x128xf32>
    %cst_96 = arith.constant 1.000000e+00 : f32
    %327 = vector.broadcast %cst_96 : f32 to vector<8x128xf32>
    %328 = arith.subf %327, %326 : vector<8x128xf32>
    %cst_97 = arith.constant 0.000000e+00 : f32
    %329 = vector.broadcast %cst_97 : f32 to vector<8x128xf32>
    %330 = arith.maximumf %329, %328 : vector<8x128xf32>
    %331 = vector.broadcast %323 : vector<8x1xf32> to vector<8x128xf32>
    %332 = arith.mulf %331, %330 : vector<8x128xf32>
    %333 = arith.addf %315, %332 : vector<8x128xf32>
    %c16_i32 = arith.constant 16 : i32
    %334 = vector.broadcast %c16_i32 : i32 to vector<1x128xi32>
    %335 = arith.cmpi eq, %21, %334 : vector<1x128xi32>
    %cst_98 = arith.constant 0.000000e+00 : f32
    %336 = vector.shape_cast %335 : vector<1x128xi1> to vector<1x128xi1>
    %337 = vector.broadcast %336 : vector<1x128xi1> to vector<8x128xi1>
    %338 = vector.broadcast %cst_98 : f32 to vector<8x128xf32>
    %339 = arith.select %337, %20, %338 : vector<8x128xi1>, vector<8x128xf32>
    %cst_99 = arith.constant dense<0.000000e+00> : vector<8xf32>
    %340 = vector.multi_reduction <add>, %339, %cst_99 [1] : vector<8x128xf32> to vector<8xf32>
    %341 = vector.shape_cast %340 : vector<8xf32> to vector<8x1xf32>
    %cst_100 = arith.constant 1.600000e+01 : f32
    %342 = vector.broadcast %cst_100 : f32 to vector<8x128xf32>
    %343 = arith.subf %44, %342 : vector<8x128xf32>
    %344 = math.absf %343 : vector<8x128xf32>
    %cst_101 = arith.constant 1.000000e+00 : f32
    %345 = vector.broadcast %cst_101 : f32 to vector<8x128xf32>
    %346 = arith.subf %345, %344 : vector<8x128xf32>
    %cst_102 = arith.constant 0.000000e+00 : f32
    %347 = vector.broadcast %cst_102 : f32 to vector<8x128xf32>
    %348 = arith.maximumf %347, %346 : vector<8x128xf32>
    %349 = vector.broadcast %341 : vector<8x1xf32> to vector<8x128xf32>
    %350 = arith.mulf %349, %348 : vector<8x128xf32>
    %351 = arith.addf %333, %350 : vector<8x128xf32>
    %352 = vector.broadcast %0 : f32 to vector<1x128xf32>
    %353 = arith.mulf %352, %28 : vector<1x128xf32>
    %354 = math.exp %353 : vector<1x128xf32>
    %cst_103 = arith.constant 1.000000e+00 : f32
    %355 = vector.broadcast %cst_103 : f32 to vector<1x128xf32>
    %356 = arith.addf %354, %355 : vector<1x128xf32>
    %357 = arith.mulf %356, %356 : vector<1x128xf32>
    %358 = arith.divf %354, %357 : vector<1x128xf32>
    %359 = vector.broadcast %358 : vector<1x128xf32> to vector<8x128xf32>
    %360 = vector.broadcast %3 : vector<8x1xf32> to vector<8x128xf32>
    %361 = arith.mulf %359, %360 : vector<8x128xf32>
    %362 = arith.mulf %351, %361 : vector<8x128xf32>
    %363 = arith.mulf %33, %362 : vector<8x128xf32>
    %c100_i32_104 = arith.constant 100 : i32
    %364 = vector.broadcast %c100_i32_104 : i32 to vector<1x128xi32>
    %365 = arith.cmpi sgt, %21, %364 : vector<1x128xi32>
    %c0_i32_105 = arith.constant 0 : i32
    %366 = vector.broadcast %c0_i32_105 : i32 to vector<1x128xi32>
    %367 = arith.cmpi eq, %21, %366 : vector<1x128xi32>
    %c100_i32_106 = arith.constant 100 : i32
    %368 = vector.broadcast %c100_i32_106 : i32 to vector<1x128xi32>
    %369 = arith.cmpi eq, %21, %368 : vector<1x128xi32>
    %370 = arith.ori %367, %369 : vector<1x128xi1>
    %cst_107 = arith.constant 5.000000e-01 : f32
    %cst_108 = arith.constant 1.000000e+00 : f32
    %371 = vector.broadcast %cst_107 : f32 to vector<1x128xf32>
    %372 = vector.broadcast %cst_108 : f32 to vector<1x128xf32>
    %373 = arith.select %370, %371, %372 : vector<1x128xi1>, vector<1x128xf32>
    %cst_109 = arith.constant 0.000000e+00 : f32
    %374 = vector.broadcast %cst_109 : f32 to vector<1x128xf32>
    %375 = arith.select %365, %374, %373 : vector<1x128xi1>, vector<1x128xf32>
    %cst_110 = arith.constant 2.000000e+00 : f32
    %376 = arith.mulf %cst_110, %0 : f32
    %cst_111 = arith.constant 1.000000e+02 : f32
    %377 = arith.divf %376, %cst_111 : f32
    %378 = vector.broadcast %377 : f32 to vector<8x1xf32>
    %379 = arith.mulf %378, %1 : vector<8x1xf32>
    %380 = vector.broadcast %375 : vector<1x128xf32> to vector<8x128xf32>
    %381 = arith.mulf %362, %380 : vector<8x128xf32>
    %cst_112 = arith.constant dense<0.000000e+00> : vector<8xf32>
    %382 = vector.multi_reduction <add>, %381, %cst_112 [1] : vector<8x128xf32> to vector<8xf32>
    %383 = vector.shape_cast %382 : vector<8xf32> to vector<8x1xf32>
    %384 = arith.mulf %383, %379 : vector<8x1xf32>
    %385 = vector.broadcast %375 : vector<1x128xf32> to vector<8x128xf32>
    %386 = arith.mulf %363, %385 : vector<8x128xf32>
    %cst_113 = arith.constant dense<0.000000e+00> : vector<8xf32>
    %387 = vector.multi_reduction <add>, %386, %cst_113 [1] : vector<8x128xf32> to vector<8xf32>
    %388 = vector.shape_cast %387 : vector<8xf32> to vector<8x1xf32>
    %cst_114 = arith.constant 0.000000e+00 : f32
    %389 = vector.broadcast %cst_114 : f32 to vector<8x1xf32>
    %390 = arith.subf %389, %388 : vector<8x1xf32>
    %391 = arith.mulf %390, %379 : vector<8x1xf32>
    %c0_i32_115 = arith.constant 0 : i32
    %392 = vector.broadcast %c0_i32_115 : i32 to vector<1x128xi32>
    %393 = arith.cmpi eq, %21, %392 : vector<1x128xi32>
    %cst_116 = arith.constant 0.000000e+00 : f32
    %394 = vector.shape_cast %393 : vector<1x128xi1> to vector<1x128xi1>
    %395 = vector.broadcast %394 : vector<1x128xi1> to vector<8x128xi1>
    %396 = vector.shape_cast %384 : vector<8x1xf32> to vector<8x1xf32>
    %397 = vector.broadcast %396 : vector<8x1xf32> to vector<8x128xf32>
    %398 = vector.broadcast %cst_116 : f32 to vector<8x128xf32>
    %399 = arith.select %395, %397, %398 : vector<8x128xi1>, vector<8x128xf32>
    %c1_i32_117 = arith.constant 1 : i32
    %400 = vector.broadcast %c1_i32_117 : i32 to vector<1x128xi32>
    %401 = arith.cmpi eq, %21, %400 : vector<1x128xi32>
    %cst_118 = arith.constant 0.000000e+00 : f32
    %402 = vector.shape_cast %401 : vector<1x128xi1> to vector<1x128xi1>
    %403 = vector.broadcast %402 : vector<1x128xi1> to vector<8x128xi1>
    %404 = vector.shape_cast %391 : vector<8x1xf32> to vector<8x1xf32>
    %405 = vector.broadcast %404 : vector<8x1xf32> to vector<8x128xf32>
    %406 = vector.broadcast %cst_118 : f32 to vector<8x128xf32>
    %407 = arith.select %403, %405, %406 : vector<8x128xi1>, vector<8x128xf32>
    %408 = arith.addf %399, %407 : vector<8x128xf32>
    %c0_119 = arith.constant 0 : index
    %c0_120 = arith.constant 0 : index
    %409 = vector.load %arg3[%c0_119, %c0_120] : memref<8x128xf32, #tpu.memory_space<vmem>>, vector<8x128xf32>
    tpu.vector_store %arg3[%c0_119, %c0_120], %408 {strides = array<i32>} : memref<8x128xf32, #tpu.memory_space<vmem>>, vector<8x128xf32>,
    return
  }
}

</mosaic_0001>

<bundles_post_ra>
// kernel: fcn_forward.1
= control target key start
LH: loop header
LB: loop body
LE: loop exit
PB: predicated region body
PF: predicated region fallthrough
CT: control target
= control target key end

     0   :  { %9 = vsyncpa [#allocation4], 0  ;;  %s455_s15 = smov [#allocation3]   ;;  %s456_s17 = smov 128   ;;  %s591_s0 = inlined_call_operand.<no memory space> [shape: f32[1,1], index: 0, kind: input, shape index: {}]   ;;  %s592_s1 = inlined_call_operand.vmem [shape: f32[8,1], index: 1, kind: input, shape index: {}]   ;;  %s593_s2 = inlined_call_operand.hbm [shape: f32[56,128], index: 2, kind: input, shape index: {}]   ;;  %s594_s3 = inlined_call_operand.vmem [shape: f32[8,128], index: 3, kind: output, shape index: {}]  }
   0x1   :  { %s18_s14 = sshll.u32 %s593_s2, 4  ;;  %s20_s16 = sshll.u32 %s455_s15, 4  ;;  %s19_s14 = int_to_ptr.hbm [resolvable:$true] %s18_s14  ;;  %s21_s16 = int_to_ptr.vmem [resolvable:$true] %s20_s16 }
   0x2   :  { %s457_s18 = smov 8  }
   0x3   :  { %26 = dma.hbm_to_vmem [thread:$0]  %s19_s14, 896, %s21_s16, [#allocation4], %s456_s17, %s456_s17, %s457_s18  }
   0x4   :  { %453 = dma.done.wait [#allocation4], 896  }
   0x5   :  { %454 = vsyncadd [#allocation4], 4294966400  ;;  %v458_v0 = vmov 0   ;;  %v487_v1 = vld [vmem:[%s592_s1] sm:$0xff]  ;;  %v53_v2 = vld [vmem:[#allocation3 + $0x28] sm:$0xff]  ;;  %vm71_vm0 = vcmask 261120   ;;  %v95_v19 = vlaneseq  ;;  %v102_v32 = vstv %s591_s0 }
   0x6   :  { %417 = vset.pattern.permute.xlu0 %v458_v0  ;;  %418 = vset.pattern.permute.xlu2 %v458_v0  ;;  %v52_v3 = vld [vmem:[#allocation3 + $0x20] sm:$0xff]  ;;  %v51_v4 = vld [vmem:[#allocation3 + $0x18] sm:$0xff]  ;;  %v50_v5 = vld [vmem:[#allocation3 + $0x10] sm:$0xff]  ;;  %v103_v35 = vmul.f32 %v102_v32, %v487_v1  ;;  %421 = vrcp.f32 %v487_v1  ;;  %v44_v47 = vand.u32 2147483648, %v487_v1  ;;  %v42_v49 = vand.u32 2147483647, %v487_v1 }
   0x7   :  { %419 = vset.pattern.permute.xlu1 %v458_v0  ;;  %57 = vperm.xlu0 %417, %v487_v1   ;;  %v48_v6 = vld [vmem:[#allocation3] sm:$0xff]  ;;  %v49_v14 = vld [vmem:[#allocation3 + $0x8] sm:$0x1]  ;;  %v420_v20 = vld [vmem:[#allocation3 + $0x30] ss:$0 sm:$0xff]  ;;  %v493_v21 = vand.u32 127, %v95_v19 }
   0x8   :  { %87 = vmatpush.msra.mxu0 %v53_v2  ;;  %v45_v50 = vor.u32 1.1754944e-38, %v44_v47  ;;  %s351_s23 = smul.f32 2.0, %s591_s0 }
   0x9   :  { %vm150_vm1 = vcmp.eq.s32.totalorder %v493_v21, 3  ;;  %vm126_vm2 = vcmp.eq.s32.totalorder %v493_v21, 1  ;;  %vm115_vm3 = vcmp.eq.s32.totalorder %v493_v21, 0  ;;  %vm162_vm4 = vcmp.eq.s32.totalorder %v493_v21, 4 }
   0xa   :  { %88 = vmatpush.msra.mxu0 %v52_v3  ;;  %vm138_vm5 = vcmp.eq.s32.totalorder %v493_v21, 2  ;;  %vm294_vm6 = vcmp.eq.s32.totalorder %v493_v21, 15  ;;  %vm186_vm7 = vcmp.eq.s32.totalorder %v493_v21, 6  ;;  %vm174_vm8 = vcmp.eq.s32.totalorder %v493_v21, 5 }
   0xb   :  { %vm210_vm9 = vcmp.eq.s32.totalorder %v493_v21, 8  ;;  %vm198_vm10 = vcmp.eq.s32.totalorder %v493_v21, 7  ;;  %vm234_vm11 = vcmp.eq.s32.totalorder %v493_v21, 10  ;;  %vm222_vm12 = vcmp.eq.s32.totalorder %v493_v21, 9 }
   0xc   :  { %89 = vmatpush.msra.mxu0 %v51_v4  ;;  %vm258_vm13 = vcmp.eq.s32.totalorder %v493_v21, 12  ;;  %vm246_vm14 = vcmp.eq.s32.totalorder %v493_v21, 11  ;;  %vm282_vm15 = vcmp.eq.s32.totalorder %v493_v21, 14  ;;  %v422_v40 = vpop.eup %421 }
   0xd   :  { %v34_v43 = vmul.f32 %v422_v40, %v487_v1 }
   0xe   :  { %90 = vmatpush.msra.mxu0 %v50_v5 }
   0xf   :  { %v35_v44 = vsub.f32 1.0, %v34_v43 }
  0x11   :  { %v36_v46 = vmul.f32 %v422_v40, %v35_v44 }
  0x13   :  { %v37_v48 = vadd.f32 %v422_v40, %v36_v46 }
  0x79   :  { %v490_v7 = vpop.permute.xlu0 %57 }
  0x7a   :  { %v60_v8 = vmul.f32 %v490_v7, %v48_v6 }
  0x7c   :  { %v61_v9 = vrot.slane %v60_v8, 4 }
  0x7e   :  { %v62_v10 = vadd.f32 %v61_v9, %v60_v8 }
  0x80   :  { %v63_v11 = vrot.slane %v62_v10, 2 }
  0x82   :  { %v64_v12 = vadd.f32 %v63_v11, %v62_v10 }
  0x84   :  { %v65_v13 = vrot.slane %v64_v12, 1 }
  0x86   :  { %v66_v15 = vadd.f32 %v65_v13, %v64_v12 }
  0x88   :  { %v67_v16 = vadd.f32 %v66_v15, %v49_v14 }
  0x8a   :  { %v68_v17 = vmax.f32 %v67_v16, 0.0 }
  0x8c   :  { %v69_v18 = vperm.slane %v68_v17, 0 }
  0x8e   :  { %391 = vmatmul.msk.f32.vlgmr.msra.gmra.mxu0 %vm71_vm0, %v69_v18  ;;  %vm270_vm0 = vcmp.eq.s32.totalorder %v493_v21, 13 }
 0x10b   :  { %v92_v22 = vpop.f32.mrf.mxu0 }
 0x10c   :  { %v93_v23 = vadd.f32 %v420_v20, %v92_v22 }
 0x10e   :  { %v153_v24 = vsel %vm150_vm1, %v93_v23, 0.0  ;;  %v129_v25 = vsel %vm126_vm2, %v93_v23, 0.0  ;;  %v118_v26 = vsel %vm115_vm3, %v93_v23, 0.0  ;;  %v165_v27 = vsel %vm162_vm4, %v93_v23, 0.0 }
 0x10f   :  { %154 = vadd.xlane.f32.xlu2 %v153_v24  ;;  %130 = vadd.xlane.f32.xlu1 %v129_v25  ;;  %v141_v28 = vsel %vm138_vm5, %v93_v23, 0.0  ;;  %v297_v29 = vsel %vm294_vm6, %v93_v23, 0.0  ;;  %v189_v30 = vsel %vm186_vm7, %v93_v23, 0.0  ;;  %v177_v31 = vsel %vm174_vm8, %v93_v23, 0.0 }
 0x110   :  { %119 = vadd.xlane.f32.xlu0 %v118_v26  ;;  %v213_v33 = vsel %vm210_vm9, %v93_v23, 0.0  ;;  %v201_v34 = vsel %vm198_vm10, %v93_v23, 0.0  ;;  %v237_v36 = vsel %vm234_vm11, %v93_v23, 0.0  ;;  %v225_v37 = vsel %vm222_vm12, %v93_v23, 0.0 }
 0x111   :  { %v261_v38 = vsel %vm258_vm13, %v93_v23, 0.0  ;;  %v249_v39 = vsel %vm246_vm14, %v93_v23, 0.0  ;;  %v285_v41 = vsel %vm282_vm15, %v93_v23, 0.0  ;;  %v273_v42 = vsel %vm270_vm0, %v93_v23, 0.0 }
 0x112   :  { %vm306_vm1 = vcmp.eq.s32.totalorder %v493_v21, 16  ;;  %vm38_vm4 = vweird.f32 %v487_v1  ;;  %vm39_vm5 = vweird.f32 %v422_v40  ;;  %vm43_vm7 = vcmp.eq.f32.partialorder %v42_v49, 8.507059e+37 }
 0x113   :  { %v309_v45 = vsel %vm306_vm1, %v93_v23, 0.0  ;;  %vm40_vm6 = vmor %vm38_vm4, %vm39_vm5  ;;  %vm97_vm8 = vcmp.lt.s32.totalorder %v493_v21, 100  ;;  %vm347_vm13 = vcmp.eq.s32.totalorder %v493_v21, 100  ;;  %vm346_vm0 = vcmp.gt.s32.totalorder %v493_v21, 100 }
 0x114   :  { %v41_v51 = vsel %vm40_vm6, %v422_v40, %v37_v48  ;;  %v98_v53 = vsel %vm97_vm8, %v493_v21, 100  ;;  %vm348_vm15 = vmor %vm115_vm3, %vm347_vm13 }
 0x115   :  { %v46_v52 = vsel %vm43_vm7, %v45_v50, %v41_v51  ;;  %v99_v54 = vcvt.s32.f32 %v98_v53 }
 0x117   :  { %166 = vadd.xlane.f32.xlu2 %v165_v27  ;;  %142 = vadd.xlane.f32.xlu1 %v141_v28  ;;  %v100_v55 = vmul.f32 0.02, %v99_v54 }
 0x118   :  { %298 = vadd.xlane.f32.xlu0 %v297_v29 }
 0x119   :  { %v527_v56 = vadd.f32 -1.0, %v100_v55 }
 0x11b   :  { %v110_v57 = vmul.f32 %v527_v56, %v490_v7  ;;  %v318_v62 = vmul.f32 %v527_v56, %v102_v32 }
 0x11d   :  { %v111_v58 = vadd.f32 1.0, %v110_v57  ;;  %v319_v4 = vmul.f32 1.442695, %v318_v62 }
 0x11f   :  { %190 = vadd.xlane.f32.xlu2 %v189_v30  ;;  %178 = vadd.xlane.f32.xlu1 %v177_v31  ;;  %v112_v59 = vmul.f32 8.0, %v111_v58  ;;  %423 = vpow2.f32 %v319_v4 }
 0x121   :  { %v113_v60 = vmax.f32 %v112_v59, 0.0 }
 0x123   :  { %v531_v61 = vmin.f32 %v113_v60, 16.0 }
 0x125   :  { %v393_v63 = vadd.f32 -1.0, %v531_v61  ;;  %v394_v0 = vadd.f32 -2.0, %v531_v61  ;;  %v121_v6 = vand.u32 2147483647, %v531_v61  ;;  %v395_v7 = vadd.f32 -3.0, %v531_v61  ;;  %v540_v20 = vpop.eup %423 }
 0x126   :  { %v396_v13 = vadd.f32 -4.0, %v531_v61  ;;  %v397_v19 = vadd.f32 -5.0, %v531_v61  ;;  %v321_v29 = vadd.f32 1.0, %v540_v20  ;;  %v398_v31 = vadd.f32 -6.0, %v531_v61 }
 0x127   :  { %214 = vadd.xlane.f32.xlu2 %v213_v33  ;;  %202 = vadd.xlane.f32.xlu1 %v201_v34  ;;  %v133_v5 = vand.u32 2147483647, %v393_v63  ;;  %v145_v8 = vand.u32 2147483647, %v394_v0  ;;  %v122_v10 = vsub.f32 1.0, %v121_v6  ;;  %v399_v32 = vadd.f32 -7.0, %v531_v61 }
 0x128   :  { %v157_v16 = vand.u32 2147483647, %v395_v7  ;;  %v169_v25 = vand.u32 2147483647, %v396_v13  ;;  %v181_v28 = vand.u32 2147483647, %v397_v19 }
 0x129   :  { %v134_v9 = vsub.f32 1.0, %v133_v5  ;;  %v146_v12 = vsub.f32 1.0, %v145_v8  ;;  %v123_v18 = vmax.f32 %v122_v10, 0.0  ;;  %v400_v46 = vadd.f32 -8.0, %v531_v61 }
 0x12a   :  { %v158_v26 = vsub.f32 1.0, %v157_v16  ;;  %v170_v33 = vsub.f32 1.0, %v169_v25  ;;  %v401_v47 = vadd.f32 -9.0, %v531_v61  ;;  %v402_v58 = vadd.f32 -10.0, %v531_v61 }
 0x12b   :  { %v135_v17 = vmax.f32 %v134_v9, 0.0  ;;  %v147_v24 = vmax.f32 %v146_v12, 0.0  ;;  %v217_v55 = vand.u32 2147483647, %v400_v46  ;;  %v403_v63 = vadd.f32 -11.0, %v531_v61 }
 0x12c   :  { %106 = vperm.xlu0 %417, %v103_v35   ;;  %v171_v43 = vmax.f32 %v170_v33, 0.0  ;;  %v229_v57 = vand.u32 2147483647, %v401_v47  ;;  %v241_v6 = vand.u32 2147483647, %v402_v58  ;;  %v404_v12 = vadd.f32 -12.0, %v531_v61 }
 0x12d   :  { %v253_v7 = vand.u32 2147483647, %v403_v63  ;;  %v406_v25 = vadd.f32 -14.0, %v531_v61  ;;  %v459_v47 = vmov 100.0  }
 0x12e   :  { %v230_v5 = vsub.f32 1.0, %v229_v57  ;;  %v242_v16 = vsub.f32 1.0, %v241_v6 }
 0x12f   :  { %238 = vadd.xlane.f32.xlu2 %v237_v36  ;;  %226 = vadd.xlane.f32.xlu1 %v225_v37  ;;  %v159_v36 = vmax.f32 %v158_v26, 0.0 }
 0x137   :  { %262 = vadd.xlane.f32.xlu2 %v261_v38  ;;  %250 = vadd.xlane.f32.xlu1 %v249_v39  ;;  %v182_v38 = vsub.f32 1.0, %v181_v28  ;;  %v545_v39 = vmul.f32 %v321_v29, %v321_v29  ;;  %v243_v28 = vmax.f32 %v242_v16, 0.0 }
 0x139   :  { %425 = vrcp.f32 %v545_v39  ;;  %vm328_vm9 = vweird.f32 %v545_v39 }
 0x13a   :  { %427 = vrcp.f32 %v459_v47 }
 0x13f   :  { %286 = vadd.xlane.f32.xlu2 %v285_v41  ;;  %274 = vadd.xlane.f32.xlu1 %v273_v42  ;;  %v193_v41 = vand.u32 2147483647, %v398_v31  ;;  %v205_v42 = vand.u32 2147483647, %v399_v32  ;;  %v552_v0 = vpop.eup %425  ;;  %v407_v32 = vadd.f32 -15.0, %v531_v61 }
 0x140   :  { %v324_v9 = vmul.f32 %v552_v0, %v545_v39  ;;  %vm329_vm10 = vweird.f32 %v552_v0  ;;  %v428_v63 = vpop.eup %427 }
 0x141   :  { %v194_v49 = vsub.f32 1.0, %v193_v41  ;;  %v206_v51 = vsub.f32 1.0, %v205_v42  ;;  %v408_v41 = vadd.f32 -16.0, %v531_v61  ;;  %v334_v42 = vand.u32 2147483648, %v545_v39  ;;  %vm567_vm11 = vmor %vm328_vm9, %vm329_vm10 }
 0x142   :  { %vm357_vm14 = vweird.f32 %v428_v63 }
 0x143   :  { %v195_v59 = vmax.f32 %v194_v49, 0.0  ;;  %v207_v62 = vmax.f32 %v206_v51, 0.0 }
 0x147   :  { %310 = vadd.xlane.f32.xlu1 %v309_v45  ;;  %v183_v45 = vmax.f32 %v182_v38, 0.0 }
 0x157   :  { %340 = vperm.xlu2 %418, %v46_v52  }
 0x182   :  { %v155_v2 = vpop.xlane.xlu2 %154  ;;  %v131_v3 = vpop.xlane.xlu1 %130 }
 0x183   :  { %v120_v11 = vpop.xlane.xlu0 %119  ;;  %v136_v22 = vmul.f32 %v135_v17, %v131_v3  ;;  %v160_v40 = vmul.f32 %v159_v36, %v155_v2  ;;  %v218_v3 = vsub.f32 1.0, %v217_v55  ;;  %v405_v17 = vadd.f32 -13.0, %v531_v61 }
 0x184   :  { %v124_v23 = vmul.f32 %v123_v18, %v120_v11  ;;  %v289_v36 = vand.u32 2147483647, %v406_v25 }
 0x185   :  { %v219_v13 = vmax.f32 %v218_v3, 0.0 }
 0x186   :  { %v137_v30 = vadd.f32 %v136_v22, %v124_v23  ;;  %v254_v22 = vsub.f32 1.0, %v253_v7  ;;  %v325_v23 = vsub.f32 1.0, %v324_v9  ;;  %v290_v51 = vsub.f32 1.0, %v289_v36 }
 0x188   :  { %v326_v31 = vmul.f32 %v552_v0, %v325_v23 }
 0x18a   :  { %v167_v14 = vpop.xlane.xlu2 %166  ;;  %v143_v15 = vpop.xlane.xlu1 %142 }
 0x18b   :  { %v148_v27 = vmul.f32 %v147_v24, %v143_v15  ;;  %v172_v48 = vmul.f32 %v171_v43, %v167_v14  ;;  %v231_v15 = vmax.f32 %v230_v5, 0.0  ;;  %v265_v24 = vand.u32 2147483647, %v404_v12 }
 0x18d   :  { %v149_v37 = vadd.f32 %v148_v27, %v137_v30  ;;  %v277_v27 = vand.u32 2147483647, %v405_v17  ;;  %v255_v30 = vmax.f32 %v254_v22, 0.0  ;;  %v266_v33 = vsub.f32 1.0, %v265_v24 }
 0x18f   :  { %v161_v44 = vadd.f32 %v160_v40, %v149_v37  ;;  %v278_v40 = vsub.f32 1.0, %v277_v27  ;;  %v267_v49 = vmax.f32 %v266_v33, 0.0 }
 0x191   :  { %v173_v54 = vadd.f32 %v172_v48, %v161_v44  ;;  %v327_v44 = vadd.f32 %v552_v0, %v326_v31  ;;  %v301_v48 = vand.u32 2147483647, %v407_v32 }
 0x192   :  { %v191_v34 = vpop.xlane.xlu2 %190  ;;  %v179_v35 = vpop.xlane.xlu1 %178 }
 0x193   :  { %v184_v50 = vmul.f32 %v183_v45, %v179_v35  ;;  %v196_v2 = vmul.f32 %v195_v59, %v191_v34  ;;  %v332_v45 = vand.u32 2147483647, %v545_v39  ;;  %v331_v55 = vsel %vm567_vm11, %v552_v0, %v327_v44 }
 0x194   :  { %v302_v58 = vsub.f32 1.0, %v301_v48  ;;  %v291_v59 = vmax.f32 %v290_v51, 0.0 }
 0x195   :  { %v185_v60 = vadd.f32 %v184_v50, %v173_v54  ;;  %v279_v54 = vmax.f32 %v278_v40, 0.0  ;;  %vm333_vm12 = vcmp.eq.f32.partialorder %v332_v45, 8.507059e+37 }
 0x196   :  { %v303_v7 = vmax.f32 %v302_v58, 0.0 }
 0x197   :  { %v197_v8 = vadd.f32 %v196_v2, %v185_v60  ;;  %v299_v2 = vpop.xlane.xlu0 %298 }
 0x198   :  { %v304_v0 = vmul.f32 %v303_v7, %v299_v2 }
 0x19a   :  { %v215_v52 = vpop.xlane.xlu2 %214  ;;  %v203_v53 = vpop.xlane.xlu1 %202 }
 0x19b   :  { %v208_v4 = vmul.f32 %v207_v62, %v203_v53  ;;  %v220_v18 = vmul.f32 %v219_v13, %v215_v52  ;;  %v313_v52 = vand.u32 2147483647, %v408_v41  ;;  %v335_v53 = vor.u32 1.1754944e-38, %v334_v42 }
 0x19d   :  { %v209_v14 = vadd.f32 %v208_v4, %v197_v8  ;;  %v336_v3 = vsel %vm333_vm12, %v335_v53, %v331_v55  ;;  %v314_v6 = vsub.f32 1.0, %v313_v52  ;;  %v353_v8 = vmul.f32 100.0, %v428_v63 }
 0x19f   :  { %v221_v26 = vadd.f32 %v220_v18, %v209_v14  ;;  %v315_v12 = vmax.f32 %v314_v6, 0.0  ;;  %v107_v22 = vpop.permute.xlu0 %106 }
 0x1a2   :  { %v239_v10 = vpop.xlane.xlu2 %238  ;;  %v227_v11 = vpop.xlane.xlu1 %226 }
 0x1a3   :  { %v232_v19 = vmul.f32 %v231_v15, %v227_v11  ;;  %v244_v37 = vmul.f32 %v243_v28, %v239_v10  ;;  %v337_v10 = vmul.f32 %v540_v20, %v336_v3  ;;  %v354_v11 = vsub.f32 1.0, %v353_v8 }
 0x1a4   :  { %v109_v20 = vmul.f32 %v527_v56, %v107_v22 }
 0x1a5   :  { %v233_v29 = vadd.f32 %v232_v19, %v221_v26  ;;  %v355_v13 = vmul.f32 %v428_v63, %v354_v11  ;;  %v460_v26 = vmov 1.0  }
 0x1a6   :  { %v349_v27 = vsel %vm348_vm15, 0.5, %v460_v26 }
 0x1a7   :  { %v245_v43 = vadd.f32 %v244_v37, %v233_v29  ;;  %v356_v19 = vadd.f32 %v428_v63, %v355_v13  ;;  %v350_v29 = vsel %vm346_vm0, 0.0, %v349_v27 }
 0x1a9   :  { %v358_v24 = vsel %vm357_vm14, %v428_v63, %v356_v19 }
 0x1aa   :  { %v263_v34 = vpop.xlane.xlu2 %262  ;;  %v251_v35 = vpop.xlane.xlu1 %250  ;;  %409 = vpush %v358_v24 }
 0x1ab   :  { %v256_v38 = vmul.f32 %v255_v30, %v251_v35  ;;  %v268_v61 = vmul.f32 %v267_v49, %v263_v34 }
 0x1ad   :  { %v257_v50 = vadd.f32 %v256_v38, %v245_v43 }
 0x1af   :  { %v269_v60 = vadd.f32 %v268_v61, %v257_v50 }
 0x1b2   :  { %v287_v39 = vpop.xlane.xlu2 %286  ;;  %v275_v57 = vpop.xlane.xlu1 %274 }
 0x1b3   :  { %v280_v62 = vmul.f32 %v279_v54, %v275_v57  ;;  %v292_v4 = vmul.f32 %v291_v59, %v287_v39 }
 0x1b5   :  { %v281_v5 = vadd.f32 %v280_v62, %v269_v60 }
 0x1b7   :  { %v293_v9 = vadd.f32 %v292_v4, %v281_v5 }
 0x1b9   :  { %v305_v16 = vadd.f32 %v304_v0, %v293_v9 }
 0x1ba   :  { %v311_v14 = vpop.xlane.xlu1 %310  ;;  %v341_v15 = vpop.permute.xlu2 %340 }
 0x1bb   :  { %v316_v17 = vmul.f32 %v315_v12, %v311_v14  ;;  %v343_v18 = vmul.f32 %v341_v15, %v337_v10 }
 0x1bd   :  { %v317_v23 = vadd.f32 %v316_v17, %v305_v16 }
 0x1bf   :  { %v344_v25 = vmul.f32 %v343_v18, %v317_v23 }
 0x1c1   :  { %v345_v28 = vmul.f32 %v344_v25, %v109_v20  ;;  %v363_v31 = vmul.f32 %v350_v29, %v344_v25 }
 0x1c3   :  { %v367_v30 = vmul.f32 %v350_v29, %v345_v28 }
 0x1c5   :  { %368 = vadd.xlane.f32.xlu1 %v367_v30 }
 0x1cd   :  { %364 = vadd.xlane.f32.xlu1 %v363_v31 }
 0x1db   :  { %s410_s24 = spop %409 }
 0x1dc   :  { %s360_s25 = smul.f32 %s410_s24, %s351_s23 }
 0x1de   :  { %v361_v32 = vstv %s360_s25 }
 0x1df   :  { %v362_v56 = vmul.f32 %v361_v32, %v487_v1 }
 0x238   :  { %v369_v33 = vpop.xlane.xlu1 %368 }
 0x239   :  { %v370_v34 = vsub.f32 0.0, %v369_v33 }
 0x23b   :  { %v371_v35 = vmul.f32 %v370_v34, %v362_v56 }
 0x23d   :  { %380 = vperm.xlu1 %419, %v371_v35  }
 0x240   :  { %v365_v36 = vpop.xlane.xlu1 %364 }
 0x241   :  { %v366_v37 = vmul.f32 %v365_v36, %v362_v56 }
 0x243   :  { %374 = vperm.xlu0 %417, %v366_v37  }
 0x2af   :  { %v381_v38 = vpop.permute.xlu1 %380 }
 0x2b0   :  { %v383_v41 = vsel %vm126_vm2, %v381_v38, 0.0 }
 0x2b5   :  { %v375_v40 = vpop.permute.xlu0 %374 }
 0x2b6   :  { %v377_v42 = vsel %vm115_vm3, %v375_v40, 0.0 }
 0x2b7   :  { %v384_v43 = vadd.f32 %v383_v41, %v377_v42 }
 0x2b9   :  { %385 = vst [vmem:[%s594_s3] sm:$0xff] %v384_v43 }
 0x2ba   :  { %390 = vsyncpa [#allocation4], 1 }

</bundles_post_ra>
